<compile_context>
chip_gen: v6e
topology: v6e:2x2x1
jax: 0.10.0
libtpu: 0.0.40
codegen_flags: <defaults>
</compile_context>

<pallas_src>
import jax
import jax.numpy as jnp
from jax import lax
from jax.experimental import pallas as pl
from jax.experimental.pallas import tpu as pltpu

_LANES = 128


def _work_dtype(dtype):
    """32-bit dtype used for the in-kernel transpose (exact for the op)."""
    dt = jnp.dtype(dtype)
    if dt.itemsize == 4:
        return dtype
    if jnp.issubdtype(dt, jnp.floating):
        return jnp.float32
    return jnp.int32


def _col0_lane_dense_kernel(x_ref, o_ref, acc_ref):
    # x_ref:   (TILE_R, C) with C = min(D, 128)
    # o_ref:   (K, 128), K = TILE_R // 128  -- lane-dense column-0 values
    # acc_ref: (K, 128) VMEM scratch in a 32-bit working dtype
    k = acc_ref.shape[0]
    c = x_ref.shape[1]
    slab = c if c < 8 else 8
    work_dt = acc_ref.dtype

    def body(j, carry):
        r0 = pl.multiple_of(j * _LANES, _LANES)
        # Narrow (128, slab) slab -> 32-bit -> XLU transpose -> (slab, 128)
        sub = x_ref[pl.ds(r0, _LANES), 0:slab]
        sub_t = jnp.transpose(sub.astype(work_dt))
        acc_ref[pl.ds(j, 1), :] = sub_t[0:1, :]
        return carry

    lax.fori_loop(0, k, body, None, unroll=min(k, 8))
    # Single bulk, lane-dense store (unmasked vst; packed dtypes cast once here).
    o_ref[...] = acc_ref[...].astype(o_ref.dtype)


def _col0_lane_sparse_kernel(x_ref, o_ref):
    # Fallback (R % 128 != 0): x_ref (TILE_R, C) ; o_ref (TILE_R, 1)
    o_ref[...] = x_ref[:, 0:1]


def _pick_lane_dense_tile(R, C, itemsize, max_block_bytes=8 << 20):
    # Rows per grid step. Small R: one full-rows block (always a legal block).
    if R <= 4096:
        return R
    # Multiple of 4096 (so the (K,128) output block's sublane dim is a multiple
    # of 32 for every dtype), capped by an ~8 MiB input block and by R itself.
    t = min(32768, max_block_bytes // max(1, C * itemsize), (R // 4096) * 4096)
    return max(4096, (t // 4096) * 4096)


def _pick_lane_sparse_tile(R, C, itemsize, max_block_bytes=8 << 20):
    if R <= 8192:
        return R
    t = min(32768, max_block_bytes // max(1, C * itemsize), (R // 4096) * 4096)
    return max(4096, (t // 4096) * 4096)


def strided_and_slice(x):
    """Pallas equivalent of StridedAndSlice.forward: x[..., 0]."""
    assert x.ndim > 1
    lead_shape = x.shape[:-1]
    D = x.shape[-1]
    R = 1
    for s in lead_shape:
        R *= s
    x2d = x.reshape(R, D)

    # Only the first <=128-lane column chunk of the last dim is ever DMA'd.
    C = D if D < _LANES else _LANES
    itemsize = jnp.dtype(x.dtype).itemsize
    cost = pl.CostEstimate(flops=0, transcendentals=0,
                           bytes_accessed=int(R * C * itemsize + R * itemsize))

    if R % _LANES == 0:
        # Lane-dense path: output laid out as (R//128, 128); out2d[j, l] holds
        # column 0 of row j*128+l, so a row-major reshape reproduces x[..., 0].
        tile_r = _pick_lane_dense_tile(R, C, itemsize)
        k = tile_r // _LANES
        in_block_bytes = tile_r * C * itemsize
        vmem_limit = int(min(56 << 20, max(32 << 20, 2 * in_block_bytes + (8 << 20))))
        out2d = pl.pallas_call(
            _col0_lane_dense_kernel,
            out_shape=jax.ShapeDtypeStruct((R // _LANES, _LANES), x.dtype),
            grid_spec=pltpu.PrefetchScalarGridSpec(
                num_scalar_prefetch=0,
                grid=(pl.cdiv(R, tile_r),),
                # Column-block 0 only: blocks (i, j>0) are never touched.
                in_specs=[pl.BlockSpec((tile_r, C), lambda i: (i, 0))],
                out_specs=pl.BlockSpec((k, _LANES), lambda i: (i, 0)),
                scratch_shapes=[pltpu.VMEM((k, _LANES), _work_dtype(x.dtype))],
            ),
            compiler_params=pltpu.CompilerParams(
                dimension_semantics=("parallel",),
                vmem_limit_bytes=vmem_limit,
            ),
            cost_estimate=cost,
        )(x2d)
        return out2d.reshape(lead_shape)

    # Fallback for R not divisible by 128: lane-sparse (R, 1) output, still
    # tiled, ragged last block, column-chunk restricted.
    tile_r = _pick_lane_sparse_tile(R, C, itemsize)
    in_block_bytes = tile_r * C * itemsize
    vmem_limit = int(min(56 << 20, max(32 << 20, 2 * in_block_bytes + (8 << 20))))
    out2d = pl.pallas_call(
        _col0_lane_sparse_kernel,
        out_shape=jax.ShapeDtypeStruct((R, 1), x.dtype),
        grid_spec=pltpu.PrefetchScalarGridSpec(
            num_scalar_prefetch=0,
            grid=(pl.cdiv(R, tile_r),),
            in_specs=[pl.BlockSpec((tile_r, C), lambda i: (i, 0))],
            out_specs=pl.BlockSpec((tile_r, 1), lambda i: (i, 0)),
        ),
        compiler_params=pltpu.CompilerParams(
            dimension_semantics=("parallel",),
            vmem_limit_bytes=vmem_limit,
        ),
        cost_estimate=cost,
    )(x2d)
    return out2d.reshape(lead_shape)


if __name__ == "__main__":
    key = jax.random.PRNGKey(0)

    # Main case: batch=2, channels=4, spatial=16, hidden=128 (lane-dense f32 path)
    x = jax.random.normal(key, (2, 4, 16, 128), dtype=jnp.float32)
    out = strided_and_slice(x)
    jax.block_until_ready(out)
    ref = x[..., 0]
    assert out.shape == ref.shape, (out.shape, ref.shape)
    assert out.dtype == ref.dtype
    assert jnp.array_equal(out, ref), "f32 lane-dense mismatch vs reference slice"

    # bf16 now also takes the lane-dense path (32-bit transpose + bulk store).
    xb = x.astype(jnp.bfloat16)
    outb = strided_and_slice(xb)
    jax.block_until_ready(outb)
    assert jnp.array_equal(outb, xb[..., 0]), "bf16 lane-dense mismatch"

    # Rows not divisible by 128 -> lane-sparse fallback.
    xs = jax.random.normal(key, (3, 5, 7), dtype=jnp.float32)
    outs = strided_and_slice(xs)
    jax.block_until_ready(outs)
    assert jnp.array_equal(outs, xs[..., 0]), "lane-sparse fallback mismatch"

    print("KERNEL_OK")
</pallas_src>

<mosaic_0001>
module attributes {stable_mosaic.version = 11 : i64} {
  func.func @_col0_lane_dense_kernel(%arg0: i32, %arg1: memref<128x128xf32, #tpu.memory_space<vmem>>, %arg2: memref<1x128xf32, #tpu.memory_space<vmem>>, %arg3: memref<1x128xf32, #tpu.memory_space<vmem>>) attributes {dimension_semantics = [#tpu.dimension_semantics<parallel>], iteration_bounds = array<i64: 1>, scalar_prefetch = 0 : i64, scratch_operands = 1 : i64, tpu.core_type = #tpu.core_type<tc>, window_params = [{transform_indices = @transform_0, window_bounds = array<i64: 128, 128>}, {transform_indices = @transform_1, window_bounds = array<i64: 1, 128>}]} {
    %c0_i32 = arith.constant 0 : i32
    %c128_i32 = arith.constant 128 : i32
    %0 = arith.muli %c0_i32, %c128_i32 : i32
    %1 = tpu.assume_multiple %0, 128 : i32
    %2 = arith.index_cast %1 : i32 to index
    %c0 = arith.constant 0 : index
    %3 = vector.load %arg1[%2, %c0] : memref<128x128xf32, #tpu.memory_space<vmem>>, vector<128x8xf32>
    %4 = tpu.transpose %3, [1, 0] : vector<128x8xf32> -> vector<8x128xf32>
    %5 = vector.extract_strided_slice %4 {offsets = [0, 0], sizes = [1, 128], strides = [1, 1]} : vector<8x128xf32> to vector<1x128xf32>
    %6 = arith.index_cast %c0_i32 : i32 to index
    %c0_0 = arith.constant 0 : index
    %7 = vector.load %arg3[%6, %c0_0] : memref<1x128xf32, #tpu.memory_space<vmem>>, vector<1x128xf32>
    tpu.vector_store %arg3[%6, %c0_0], %5 {strides = array<i32>} : memref<1x128xf32, #tpu.memory_space<vmem>>, vector<1x128xf32>,
    %c1_i32 = arith.constant 1 : i32
    %c0_1 = arith.constant 0 : index
    %c0_2 = arith.constant 0 : index
    %8 = vector.load %arg3[%c0_1, %c0_2] : memref<1x128xf32, #tpu.memory_space<vmem>>, vector<1x128xf32>
    %c0_3 = arith.constant 0 : index
    %c0_4 = arith.constant 0 : index
    %9 = vector.load %arg2[%c0_3, %c0_4] : memref<1x128xf32, #tpu.memory_space<vmem>>, vector<1x128xf32>
    tpu.vector_store %arg2[%c0_3, %c0_4], %8 {strides = array<i32>} : memref<1x128xf32, #tpu.memory_space<vmem>>, vector<1x128xf32>,
    return
  }
  func.func @transform_0(%arg0: i32) -> (i32, i32) {
    %c0_i32 = arith.constant 0 : i32
    %c0_i32_0 = arith.constant 0 : i32
    return %arg0, %c0_i32 : i32, i32
  }
  func.func @transform_1(%arg0: i32) -> (i32, i32) {
    %c0_i32 = arith.constant 0 : i32
    %c0_i32_0 = arith.constant 0 : i32
    return %arg0, %c0_i32 : i32, i32
  }
}

</mosaic_0001>

<bundles_post_ra>
// kernel: tpu_custom_call.1
= control target key start
LH: loop header
LB: loop body
LE: loop exit
PB: predicated region body
PF: predicated region fallthrough
CT: control target
= control target key end

     0   :  { %6 = vsyncpa [#allocation4], 0  ;;  %s157_s0 = inlined_call_operand.hbm [shape: f32[128,128], index: 0, kind: input, shape index: {}]   ;;  %s158_s1 = inlined_call_operand.hbm [shape: f32[1,128], index: 1, kind: output, shape index: {}]  }
   0x1   :  { %7 = vsyncpa [#allocation5], 0  ;;  %s137_s6 = smov [#allocation3]  }
   0x2   :  { %s13_s7 = sshll.u32 %s137_s6, 4  ;;  %s14_s7 = int_to_ptr.vmem [resolvable:$true] %s13_s7 }
   0x3   :  { %s101_s8 = scalar_lea.vmem %s14_s7, 2048  ;;  %p106_p1 = scmp.lt.s32.totalorder %s14_s7, %s14_s7 }
   0x4   :  { %p102_p0 = scmp.ne.s32.totalorder %s14_s7, %s101_s8  ;;  %p107_p2 = scmp.lt.s32.totalorder %s101_s8, %s101_s8 }
   0x6   :  { %p108_p3 = por %p107_p2, %p106_p1 }
   0x8   :  { %p109_p4 = pnand %p108_p3, %p102_p0 }
   0xa   :  { %112 = shalt.err (!%p109_p4)
}
   0xb   :  { %s138_s9 = smov 128   ;;  %s139_s10 = smov 8  }
   0xc   :  { %19 = dma.hbm_to_vmem [thread:$0]  %s157_s0, 2048, %s14_s7, [#allocation4], %s138_s9, %s138_s9, %s139_s10  }
   0xd   :  { %133 = dma.done.wait [#allocation4], 2048  }
   0xe   :  { %134 = vsyncadd [#allocation4], 4294965248  ;;  %v23_v0 = vld [vmem:[#allocation3] sm:$0xff]  ;;  %v24_v1 = vld [vmem:[#allocation3 + $0x8] sm:$0xff]  ;;  %s140_s0 = smov [#allocation6]  }
   0xf   :  { %39 = vxpose.xlu0.b32.start [1/16] (narrow) %v23_v0, 8  ;;  %v25_v2 = vld [vmem:[#allocation3 + $0x10] sm:$0xff]  ;;  %v26_v3 = vld [vmem:[#allocation3 + $0x18] sm:$0xff]  ;;  %v27_v4 = vld [vmem:[#allocation3 + $0x20] sm:$0xff]  ;;  %s80_s13 = sshll.u32 %s140_s0, 4  ;;  %s81_s13 = int_to_ptr.vmem [resolvable:$true] %s80_s13 }
  0x10   :  { %v28_v5 = vld [vmem:[#allocation3 + $0x28] sm:$0xff]  ;;  %v29_v6 = vld [vmem:[#allocation3 + $0x30] sm:$0xff]  ;;  %v30_v7 = vld [vmem:[#allocation3 + $0x38] sm:$0xff]  ;;  %s113_s14 = scalar_lea.vmem %s81_s13, 16  ;;  %s117_s15 = scalar_lea.vmem %s81_s13, 32 }
  0x11   :  { %v31_v8 = vld [vmem:[#allocation3 + $0x40] sm:$0xff]  ;;  %v32_v9 = vld [vmem:[#allocation3 + $0x48] sm:$0xff]  ;;  %v33_v10 = vld [vmem:[#allocation3 + $0x50] sm:$0xff]  ;;  %p114_p5 = scmp.ne.s32.totalorder %s81_s13, %s113_s14  ;;  %p118_p6 = scmp.lt.s32.totalorder %s81_s13, %s81_s13 }
  0x12   :  { %v34_v11 = vld [vmem:[#allocation3 + $0x58] sm:$0xff]  ;;  %v35_v12 = vld [vmem:[#allocation3 + $0x60] sm:$0xff]  ;;  %v36_v13 = vld [vmem:[#allocation3 + $0x68] sm:$0xff]  ;;  %p119_p7 = scmp.lt.s32.totalorder %s117_s15, %s113_s14 }
  0x13   :  { %40 = vxpose.xlu0.b32.cont [2/16] (narrow) %v24_v1, 8  ;;  %v37_v14 = vld [vmem:[#allocation3 + $0x70] sm:$0xff]  ;;  %v38_v15 = vld [vmem:[#allocation3 + $0x78] sm:$0xff] }
  0x14   :  { %p120_p8 = por %p119_p7, %p118_p6 }
  0x16   :  { %p121_p9 = pnand %p120_p8, %p114_p5 }
  0x17   :  { %41 = vxpose.xlu0.b32.cont [3/16] (narrow) %v25_v2, 8 }
  0x1b   :  { %42 = vxpose.xlu0.b32.cont [4/16] (narrow) %v26_v3, 8 }
  0x1f   :  { %43 = vxpose.xlu0.b32.cont [5/16] (narrow) %v27_v4, 8 }
  0x23   :  { %44 = vxpose.xlu0.b32.cont [6/16] (narrow) %v28_v5, 8 }
  0x27   :  { %45 = vxpose.xlu0.b32.cont [7/16] (narrow) %v29_v6, 8 }
  0x2b   :  { %46 = vxpose.xlu0.b32.cont [8/16] (narrow) %v30_v7, 8 }
  0x2f   :  { %47 = vxpose.xlu0.b32.cont [9/16] (narrow) %v31_v8, 8 }
  0x33   :  { %48 = vxpose.xlu0.b32.cont [10/16] (narrow) %v32_v9, 8 }
  0x37   :  { %49 = vxpose.xlu0.b32.cont [11/16] (narrow) %v33_v10, 8 }
  0x3b   :  { %50 = vxpose.xlu0.b32.cont [12/16] (narrow) %v34_v11, 8 }
  0x3f   :  { %51 = vxpose.xlu0.b32.cont [13/16] (narrow) %v35_v12, 8 }
  0x43   :  { %52 = vxpose.xlu0.b32.cont [14/16] (narrow) %v36_v13, 8 }
  0x47   :  { %53 = vxpose.xlu0.b32.cont [15/16] (narrow) %v37_v14, 8 }
  0x4b   :  { %54 = vxpose.xlu0.b32.end [16/16] (narrow) %v38_v15, 8 }
  0x8b   :  { %v55_v16 = vpop.trf.xlu0 }
  0x8c   :  { %71 = vst [vmem:[#allocation2] sm:$0x1] %v55_v16 }
  0x93   :  { %v72_v17 = vld [vmem:[#allocation2] sm:$0x1] }
  0x94   :  { %73 = vst [vmem:[#allocation6] sm:$0x1] %v72_v17 }
  0x95   :  { %124 = shalt.err (!%p121_p9)
}
  0x96   :  { %83 = dma.vmem_to_hbm [thread:$0]  %s81_s13, 16, %s158_s1, [#allocation5]  }
  0x97   :  { %135 = dma.done.wait [#allocation5], 16  }
  0x98   :  { %136 = vsyncadd [#allocation5], 4294967280 }
  0x99   :  { %87 = vsyncpa [#allocation4], 1 }
  0x9a   :  { %88 = vsyncpa [#allocation5], 1 }

</bundles_post_ra>
